<compile_context>
chip_gen: v5e
topology: v5e:2x2
jax: 0.10.0
libtpu: 0.0.40
codegen_flags: <defaults>
</compile_context>

<pallas_src>
import jax
import jax.numpy as jnp
from jax.experimental import pallas as pl
from jax.experimental.pallas import tpu as pltpu


# ---- model dims (TeacherModel: 784 -> 256 -> 128 -> 64 -> 64 -> 10) ----
INPUT_DIM = 784
HIDDEN_DIMS = (256, 128, 64, 64)
OUTPUT_DIM = 10

# ---- layout dims ----
OUT_PAD = 128      # 10 -> 128: lane-dense output block (avoids masked partial stores)
BIAS_ROWS = 8      # packed bias slab (8, 256) f32; one row per layer (zero-padded)
BIAS_COLS = 256
TILE_B_MAX = 256   # max batch tile: multiple of 128, fills the 256-row MXU on v6e/v7x


def _round_up(n, m):
    return ((n + m - 1) // m) * m


def _mlp_kernel(x_ref, w1_ref, w2_ref, w3_ref, w4_ref, w5_ref, bias_ref, o_ref):
    """One batch tile of the full 5-layer MLP. bf16 MXU inputs, f32 accumulation."""
    b1 = bias_ref[0:1, 0:256]
    b2 = bias_ref[1:2, 0:128]
    b3 = bias_ref[2:3, 0:64]
    b4 = bias_ref[3:4, 0:64]
    b5 = bias_ref[4:5, 0:OUT_PAD]

    # f32 tile straight from HBM, cast to bf16 in registers (cheap VPU op).
    x = x_ref[...].astype(jnp.bfloat16)  # (tile_b, 784)

    h = jnp.dot(x, w1_ref[...], preferred_element_type=jnp.float32) + b1
    h = jnp.maximum(h, 0.0).astype(jnp.bfloat16)

    h = jnp.dot(h, w2_ref[...], preferred_element_type=jnp.float32) + b2
    h = jnp.maximum(h, 0.0).astype(jnp.bfloat16)

    h = jnp.dot(h, w3_ref[...], preferred_element_type=jnp.float32) + b3
    h = jnp.maximum(h, 0.0).astype(jnp.bfloat16)

    h = jnp.dot(h, w4_ref[...], preferred_element_type=jnp.float32) + b4
    h = jnp.maximum(h, 0.0).astype(jnp.bfloat16)

    out = jnp.dot(h, w5_ref[...], preferred_element_type=jnp.float32) + b5
    o_ref[...] = out.astype(o_ref.dtype)


def init_teacher_params(key, input_dim=INPUT_DIM, output_dim=OUTPUT_DIM):
    """torch.nn.Linear-style init: U(-1/sqrt(fan_in), 1/sqrt(fan_in)).

    Weights are stored (in_dim, out_dim) (transpose of torch's (out, in)) so the
    kernel computes x @ W + b directly.
    """
    dims = [input_dim, *HIDDEN_DIMS, output_dim]
    params = []
    for i in range(len(dims) - 1):
        fan_in, fan_out = dims[i], dims[i + 1]
        key, kw, kb = jax.random.split(key, 3)
        bound = 1.0 / (fan_in ** 0.5)
        w = jax.random.uniform(kw, (fan_in, fan_out), jnp.float32, -bound, bound)
        b = jax.random.uniform(kb, (fan_out,), jnp.float32, -bound, bound)
        params.append((w, b))
    return params


def pack_teacher_params(params):
    """Cast/pad the raw f32 params into the kernel layout.

    Returns:
      weights: 5 bf16 arrays [(784,256), (256,128), (128,64), (64,64), (64,128)]
               (layer-5 cols 10:128 zero so the output block is lane-dense).
      bias:    (8, 256) f32 slab, one zero-padded bias per row.
    """
    (w1, b1), (w2, b2), (w3, b3), (w4, b4), (w5, b5) = params

    w5p = jnp.zeros((64, OUT_PAD), jnp.float32).at[:, :OUTPUT_DIM].set(w5)

    weights = [
        w1.astype(jnp.bfloat16),
        w2.astype(jnp.bfloat16),
        w3.astype(jnp.bfloat16),
        w4.astype(jnp.bfloat16),
        w5p.astype(jnp.bfloat16),
    ]

    bias = jnp.zeros((BIAS_ROWS, BIAS_COLS), jnp.float32)
    bias = bias.at[0, :256].set(b1)
    bias = bias.at[1, :128].set(b2)
    bias = bias.at[2, :64].set(b3)
    bias = bias.at[3, :64].set(b4)
    bias = bias.at[4, :OUTPUT_DIM].set(b5)
    return weights, bias


@jax.jit
def teacher_model_forward(x, weights, bias):
    """x: (B, 784) float. weights/bias from pack_teacher_params. Returns (B, 10) f32."""
    x = x.astype(jnp.float32)
    B = x.shape[0]

    # Adaptive batch tile: small batches -> single small tile (round up to sublane=8),
    # large batches -> 256-row MXU-filling tiles sharded across cores.
    tile_b = min(TILE_B_MAX, _round_up(max(B, 1), 8))
    num_tiles = pl.cdiv(B, tile_b)
    B_pad = num_tiles * tile_b

    if B_pad != B:
        xp = jnp.zeros((B_pad, INPUT_DIM), jnp.float32).at[:B, :].set(x)
    else:
        xp = x

    w1, w2, w3, w4, w5 = weights

    flops = 2 * B_pad * (INPUT_DIM * 256 + 256 * 128 + 128 * 64 + 64 * 64 + 64 * OUT_PAD)
    bytes_accessed = (
        B_pad * INPUT_DIM * 4                     # f32 input
        + sum(int(w.size) for w in weights) * 2   # bf16 weights (VMEM-resident)
        + bias.size * 4                           # f32 bias slab
        + B_pad * OUT_PAD * 4                     # f32 output (lane-dense)
    )

    out_padded = pl.pallas_call(
        _mlp_kernel,
        out_shape=jax.ShapeDtypeStruct((B_pad, OUT_PAD), jnp.float32),
        grid=(num_tiles,),
        in_specs=[
            pl.BlockSpec((tile_b, INPUT_DIM), lambda i: (i, 0)),  # x: tiled over batch
            pl.BlockSpec(w1.shape, lambda i: (0, 0)),             # weights: VMEM-resident
            pl.BlockSpec(w2.shape, lambda i: (0, 0)),
            pl.BlockSpec(w3.shape, lambda i: (0, 0)),
            pl.BlockSpec(w4.shape, lambda i: (0, 0)),
            pl.BlockSpec(w5.shape, lambda i: (0, 0)),
            pl.BlockSpec(bias.shape, lambda i: (0, 0)),           # packed biases
        ],
        out_specs=pl.BlockSpec((tile_b, OUT_PAD), lambda i: (i, 0)),
        compiler_params=pltpu.CompilerParams(
            dimension_semantics=("parallel",),
        ),
        cost_estimate=pl.CostEstimate(
            flops=flops, transcendentals=0, bytes_accessed=bytes_accessed),
    )(xp, w1, w2, w3, w4, w5, bias)

    return out_padded[:B, :OUTPUT_DIM]


def _reference_forward(x, params):
    """Plain-JAX reference mirroring the kernel's bf16-weight / f32-accumulate math."""
    h = x.astype(jnp.bfloat16)
    for i, (w, b) in enumerate(params):
        h = jnp.dot(h, w.astype(jnp.bfloat16),
                    preferred_element_type=jnp.float32) + b
        if i < len(params) - 1:
            h = jnp.maximum(h, 0.0).astype(jnp.bfloat16)
    return h.astype(jnp.float32)


if __name__ == "__main__":
    key = jax.random.PRNGKey(0)
    k_params, k_x = jax.random.split(key)

    batch = 8  # small demo batch (single 8-row tile thanks to adaptive tiling)

    params = init_teacher_params(k_params)
    weights, bias = pack_teacher_params(params)
    x = jax.random.normal(k_x, (batch, INPUT_DIM), jnp.float32)

    out = teacher_model_forward(x, weights, bias)
    out = jax.block_until_ready(out)

    ref = _reference_forward(x, params)
    assert out.shape == (batch, OUTPUT_DIM), out.shape
    assert jnp.allclose(out, ref, atol=2e-2, rtol=2e-2), "mismatch vs reference"

    print("KERNEL_OK")
</pallas_src>

<mosaic_0001>
module attributes {stable_mosaic.version = 11 : i64} {
  func.func @_mlp_kernel(%arg0: i32, %arg1: memref<8x784xf32, #tpu.memory_space<vmem>>, %arg2: memref<784x256xbf16, #tpu.memory_space<vmem>>, %arg3: memref<256x128xbf16, #tpu.memory_space<vmem>>, %arg4: memref<128x64xbf16, #tpu.memory_space<vmem>>, %arg5: memref<64x64xbf16, #tpu.memory_space<vmem>>, %arg6: memref<64x128xbf16, #tpu.memory_space<vmem>>, %arg7: memref<8x256xf32, #tpu.memory_space<vmem>>, %arg8: memref<8x128xf32, #tpu.memory_space<vmem>>) attributes {dimension_semantics = [#tpu.dimension_semantics<parallel>], iteration_bounds = array<i64: 1>, scalar_prefetch = 0 : i64, scratch_operands = 0 : i64, tpu.core_type = #tpu.core_type<tc>, window_params = [{transform_indices = @transform_0, window_bounds = array<i64: 8, 784>}, {pipeline_mode = #tpu.pipeline_mode<synchronous>, transform_indices = @transform_1, window_bounds = array<i64: 784, 256>}, {pipeline_mode = #tpu.pipeline_mode<synchronous>, transform_indices = @transform_2, window_bounds = array<i64: 256, 128>}, {pipeline_mode = #tpu.pipeline_mode<synchronous>, transform_indices = @transform_3, window_bounds = array<i64: 128, 64>}, {pipeline_mode = #tpu.pipeline_mode<synchronous>, transform_indices = @transform_4, window_bounds = array<i64: 64, 64>}, {pipeline_mode = #tpu.pipeline_mode<synchronous>, transform_indices = @transform_5, window_bounds = array<i64: 64, 128>}, {pipeline_mode = #tpu.pipeline_mode<synchronous>, transform_indices = @transform_6, window_bounds = array<i64: 8, 256>}, {transform_indices = @transform_7, window_bounds = array<i64: 8, 128>}]} {
    %c0 = arith.constant 0 : index
    %c0_0 = arith.constant 0 : index
    %0 = vector.load %arg7[%c0, %c0_0] : memref<8x256xf32, #tpu.memory_space<vmem>>, vector<1x256xf32>
    %c1 = arith.constant 1 : index
    %c0_1 = arith.constant 0 : index
    %1 = vector.load %arg7[%c1, %c0_1] : memref<8x256xf32, #tpu.memory_space<vmem>>, vector<1x128xf32>
    %c2 = arith.constant 2 : index
    %c0_2 = arith.constant 0 : index
    %2 = vector.load %arg7[%c2, %c0_2] : memref<8x256xf32, #tpu.memory_space<vmem>>, vector<1x64xf32>
    %c3 = arith.constant 3 : index
    %c0_3 = arith.constant 0 : index
    %3 = vector.load %arg7[%c3, %c0_3] : memref<8x256xf32, #tpu.memory_space<vmem>>, vector<1x64xf32>
    %c4 = arith.constant 4 : index
    %c0_4 = arith.constant 0 : index
    %4 = vector.load %arg7[%c4, %c0_4] : memref<8x256xf32, #tpu.memory_space<vmem>>, vector<1x128xf32>
    %c0_5 = arith.constant 0 : index
    %c0_6 = arith.constant 0 : index
    %5 = vector.load %arg1[%c0_5, %c0_6] : memref<8x784xf32, #tpu.memory_space<vmem>>, vector<8x784xf32>
    %6 = arith.truncf %5 : vector<8x784xf32> to vector<8x784xbf16>
    %c0_7 = arith.constant 0 : index
    %c0_8 = arith.constant 0 : index
    %7 = vector.load %arg2[%c0_7, %c0_8] : memref<784x256xbf16, #tpu.memory_space<vmem>>, vector<784x256xbf16>
    %cst = arith.constant dense<0.000000e+00> : vector<8x256xf32>
    %8 = tpu.matmul %6, %7, %cst {dimension_numbers = #tpu.dot_dimension_numbers<[1], [0], [0], [1], [0, 0, 1, 1], [], []>} : vector<8x784xbf16>, vector<784x256xbf16>, vector<8x256xf32> -> vector<8x256xf32>
    %9 = vector.broadcast %0 : vector<1x256xf32> to vector<8x256xf32>
    %10 = arith.addf %8, %9 : vector<8x256xf32>
    %cst_9 = arith.constant 0.000000e+00 : f32
    %11 = vector.broadcast %cst_9 : f32 to vector<8x256xf32>
    %12 = arith.maximumf %10, %11 : vector<8x256xf32>
    %13 = arith.truncf %12 : vector<8x256xf32> to vector<8x256xbf16>
    %c0_10 = arith.constant 0 : index
    %c0_11 = arith.constant 0 : index
    %14 = vector.load %arg3[%c0_10, %c0_11] : memref<256x128xbf16, #tpu.memory_space<vmem>>, vector<256x128xbf16>
    %cst_12 = arith.constant dense<0.000000e+00> : vector<8x128xf32>
    %15 = tpu.matmul %13, %14, %cst_12 {dimension_numbers = #tpu.dot_dimension_numbers<[1], [0], [0], [1], [0, 0, 1, 1], [], []>} : vector<8x256xbf16>, vector<256x128xbf16>, vector<8x128xf32> -> vector<8x128xf32>
    %16 = vector.broadcast %1 : vector<1x128xf32> to vector<8x128xf32>
    %17 = arith.addf %15, %16 : vector<8x128xf32>
    %cst_13 = arith.constant 0.000000e+00 : f32
    %18 = vector.broadcast %cst_13 : f32 to vector<8x128xf32>
    %19 = arith.maximumf %17, %18 : vector<8x128xf32>
    %20 = arith.truncf %19 : vector<8x128xf32> to vector<8x128xbf16>
    %c0_14 = arith.constant 0 : index
    %c0_15 = arith.constant 0 : index
    %21 = vector.load %arg4[%c0_14, %c0_15] : memref<128x64xbf16, #tpu.memory_space<vmem>>, vector<128x64xbf16>
    %cst_16 = arith.constant dense<0.000000e+00> : vector<8x64xf32>
    %22 = tpu.matmul %20, %21, %cst_16 {dimension_numbers = #tpu.dot_dimension_numbers<[1], [0], [0], [1], [0, 0, 1, 1], [], []>} : vector<8x128xbf16>, vector<128x64xbf16>, vector<8x64xf32> -> vector<8x64xf32>
    %23 = vector.broadcast %2 : vector<1x64xf32> to vector<8x64xf32>
    %24 = arith.addf %22, %23 : vector<8x64xf32>
    %cst_17 = arith.constant 0.000000e+00 : f32
    %25 = vector.broadcast %cst_17 : f32 to vector<8x64xf32>
    %26 = arith.maximumf %24, %25 : vector<8x64xf32>
    %27 = arith.truncf %26 : vector<8x64xf32> to vector<8x64xbf16>
    %c0_18 = arith.constant 0 : index
    %c0_19 = arith.constant 0 : index
    %28 = vector.load %arg5[%c0_18, %c0_19] : memref<64x64xbf16, #tpu.memory_space<vmem>>, vector<64x64xbf16>
    %cst_20 = arith.constant dense<0.000000e+00> : vector<8x64xf32>
    %29 = tpu.matmul %27, %28, %cst_20 {dimension_numbers = #tpu.dot_dimension_numbers<[1], [0], [0], [1], [0, 0, 1, 1], [], []>} : vector<8x64xbf16>, vector<64x64xbf16>, vector<8x64xf32> -> vector<8x64xf32>
    %30 = vector.broadcast %3 : vector<1x64xf32> to vector<8x64xf32>
    %31 = arith.addf %29, %30 : vector<8x64xf32>
    %cst_21 = arith.constant 0.000000e+00 : f32
    %32 = vector.broadcast %cst_21 : f32 to vector<8x64xf32>
    %33 = arith.maximumf %31, %32 : vector<8x64xf32>
    %34 = arith.truncf %33 : vector<8x64xf32> to vector<8x64xbf16>
    %c0_22 = arith.constant 0 : index
    %c0_23 = arith.constant 0 : index
    %35 = vector.load %arg6[%c0_22, %c0_23] : memref<64x128xbf16, #tpu.memory_space<vmem>>, vector<64x128xbf16>
    %cst_24 = arith.constant dense<0.000000e+00> : vector<8x128xf32>
    %36 = tpu.matmul %34, %35, %cst_24 {dimension_numbers = #tpu.dot_dimension_numbers<[1], [0], [0], [1], [0, 0, 1, 1], [], []>} : vector<8x64xbf16>, vector<64x128xbf16>, vector<8x128xf32> -> vector<8x128xf32>
    %37 = vector.broadcast %4 : vector<1x128xf32> to vector<8x128xf32>
    %38 = arith.addf %36, %37 : vector<8x128xf32>
    %c0_25 = arith.constant 0 : index
    %c0_26 = arith.constant 0 : index
    %39 = vector.load %arg8[%c0_25, %c0_26] : memref<8x128xf32, #tpu.memory_space<vmem>>, vector<8x128xf32>
    tpu.vector_store %arg8[%c0_25, %c0_26], %38 {strides = array<i32>} : memref<8x128xf32, #tpu.memory_space<vmem>>, vector<8x128xf32>,
    return
  }
  func.func @transform_0(%arg0: i32) -> (i32, i32) {
    %c0_i32 = arith.constant 0 : i32
    %c0_i32_0 = arith.constant 0 : i32
    return %arg0, %c0_i32 : i32, i32
  }
  func.func @transform_1(%arg0: i32) -> (i32, i32) {
    %c0_i32 = arith.constant 0 : i32
    %c0_i32_0 = arith.constant 0 : i32
    %c0_i32_1 = arith.constant 0 : i32
    return %c0_i32, %c0_i32_0 : i32, i32
  }
  func.func @transform_2(%arg0: i32) -> (i32, i32) {
    %c0_i32 = arith.constant 0 : i32
    %c0_i32_0 = arith.constant 0 : i32
    %c0_i32_1 = arith.constant 0 : i32
    return %c0_i32, %c0_i32_0 : i32, i32
  }
  func.func @transform_3(%arg0: i32) -> (i32, i32) {
    %c0_i32 = arith.constant 0 : i32
    %c0_i32_0 = arith.constant 0 : i32
    %c0_i32_1 = arith.constant 0 : i32
    return %c0_i32, %c0_i32_0 : i32, i32
  }
  func.func @transform_4(%arg0: i32) -> (i32, i32) {
    %c0_i32 = arith.constant 0 : i32
    %c0_i32_0 = arith.constant 0 : i32
    %c0_i32_1 = arith.constant 0 : i32
    return %c0_i32, %c0_i32_0 : i32, i32
  }
  func.func @transform_5(%arg0: i32) -> (i32, i32) {
    %c0_i32 = arith.constant 0 : i32
    %c0_i32_0 = arith.constant 0 : i32
    %c0_i32_1 = arith.constant 0 : i32
    return %c0_i32, %c0_i32_0 : i32, i32
  }
  func.func @transform_6(%arg0: i32) -> (i32, i32) {
    %c0_i32 = arith.constant 0 : i32
    %c0_i32_0 = arith.constant 0 : i32
    %c0_i32_1 = arith.constant 0 : i32
    return %c0_i32, %c0_i32_0 : i32, i32
  }
  func.func @transform_7(%arg0: i32) -> (i32, i32) {
    %c0_i32 = arith.constant 0 : i32
    %c0_i32_0 = arith.constant 0 : i32
    return %arg0, %c0_i32 : i32, i32
  }
}

</mosaic_0001>

<bundles_post_ra>
// kernel: teacher_model_forward.1
= control target key start
LH: loop header
LB: loop body
LE: loop exit
PB: predicated region body
PF: predicated region fallthrough
CT: control target
= control target key end

     0   :  { %12 = vsyncpa [#allocation3], 0  ;;  %s2187_s0 = inlined_call_operand.vmem [shape: f32[8,784], index: 0, kind: input, shape index: {}]   ;;  %s2188_s1 = inlined_call_operand.hbm [shape: bf16[784,256], index: 1, kind: input, shape index: {}]   ;;  %s2189_s2 = inlined_call_operand.hbm [shape: bf16[256,128], index: 2, kind: input, shape index: {}]   ;;  %s2190_s3 = inlined_call_operand.vmem [shape: bf16[128,64], index: 3, kind: input, shape index: {}]   ;;  %s2191_s4 = inlined_call_operand.vmem [shape: bf16[64,64], index: 4, kind: input, shape index: {}]   ;;  %s2192_s5 = inlined_call_operand.hbm [shape: bf16[64,128], index: 5, kind: input, shape index: {}]   ;;  %s2193_s6 = inlined_call_operand.hbm [shape: f32[8,256], index: 6, kind: input, shape index: {}]   ;;  %s2194_s7 = inlined_call_operand.hbm [shape: f32[8,128], index: 7, kind: output, shape index: {}]  }
   0x1   :  { %13 = vsyncpa [#allocation6], 0 }
   0x2   :  { %14 = vsyncpa [#allocation9], 0  ;;  %s35_s26 = sshll.u32 %s2189_s2, 4  ;;  %s36_s26 = int_to_ptr.hbm [resolvable:$true] %s35_s26 }
   0x3   :  { %15 = vsyncpa [#allocation4], 0  ;;  %s2036_s27 = smov [#allocation5]   ;;  %s22_s8 = sshll.u32 %s2188_s1, 4  ;;  %s23_s8 = int_to_ptr.hbm [resolvable:$true] %s22_s8 }
   0x4   :  { %s37_s28 = sshll.u32 %s2036_s27, 4  ;;  %s2037_s9 = smov 64   ;;  %s38_s28 = int_to_ptr.vmem [resolvable:$true] %s37_s28 }
   0x5   :  { %s2038_s10 = smov 4   ;;  %s2039_s11 = smov [#allocation2]  }
   0x6   :  { %43 = dma.hbm_to_vmem [thread:$0]  %s36_s26, 2048, %s38_s28, [#allocation6], %s2037_s9, %s2037_s9, %s2038_s10  }
   0x7   :  { %s24_s12 = sshll.u32 %s2039_s11, 4  ;;  %s2040_s13 = smov 128   ;;  %s25_s12 = int_to_ptr.vmem [resolvable:$true] %s24_s12 }
   0x8   :  { %s2041_s14 = smov 8   ;;  %s52_s16 = sshll.u32 %s2192_s5, 4  ;;  %s53_s16 = int_to_ptr.hbm [resolvable:$true] %s52_s16 }
   0x9   :  { %30 = dma.hbm_to_vmem [thread:$0]  %s23_s8, 12544, %s25_s12, [#allocation3], %s2040_s13, %s2040_s13, %s2041_s14  }
   0xa   :  { %s2042_s17 = smov [#allocation7]   ;;  %s66_s20 = sshll.u32 %s2193_s6, 4  ;;  %s67_s20 = int_to_ptr.hbm [resolvable:$true] %s66_s20 }
   0xb   :  { %s54_s18 = sshll.u32 %s2042_s17, 4  ;;  %s2043_s21 = smov [#allocation8]   ;;  %s55_s18 = int_to_ptr.vmem [resolvable:$true] %s54_s18 }
   0xc   :  { %60 = dma.hbm_to_vmem [thread:$0]  %s53_s16, 512, %s55_s18, [#allocation6], %s2037_s9, %s2037_s9, %s2038_s10  }
   0xd   :  { %s68_s22 = sshll.u32 %s2043_s21, 4  ;;  %s69_s22 = int_to_ptr.vmem [resolvable:$true] %s68_s22 }
   0xe   :  { %71 = dma.hbm_to_vmem [thread:$0]  %s67_s20, 256, %s69_s22, [#allocation9]  }
   0xf   :  { %2028 = dma.done.wait [#allocation3], 12544  }
  0x10   :  { %2029 = vsyncadd [#allocation3], 4294954752 }
  0x11   :  { %2030 = dma.done.wait [#allocation6], 2560  }
  0x12   :  { %2031 = vsyncadd [#allocation6], 4294964736 }
  0x13   :  { %2032 = dma.done.wait [#allocation9], 256  }
  0x14   :  { %2033 = vsyncadd [#allocation9], 4294967040  ;;  %v1303_v0 = vld [vmem:[#allocation2 + $0x70] sm:$0xf]  ;;  %v1784_v1 = vld [vmem:[#allocation2 + $0x74] sm:$0xf0] }
  0x15   :  { %v1431_v2 = vld [vmem:[#allocation2 + $0x170] sm:$0xf]  ;;  %v1304_v3 = vor.u32 %v1784_v1, %v1303_v0  ;;  %v1816_v4 = vld [vmem:[#allocation2 + $0x174] sm:$0xf0]  ;;  %v1295_v11 = vld [vmem:[#allocation2 + $0x60] sm:$0xf] }
  0x16   :  { %v1495_v5 = vld [vmem:[#allocation2 + $0x1f0] sm:$0xf]  ;;  %v1832_v6 = vld [vmem:[#allocation2 + $0x1f4] sm:$0xf0]  ;;  %v1432_v7 = vor.u32 %v1816_v4, %v1431_v2  ;;  %v1782_v13 = vld [vmem:[#allocation2 + $0x64] sm:$0xf0] }
  0x17   :  { %v1496_v8 = vor.u32 %v1832_v6, %v1495_v5  ;;  %v1367_v9 = vld [vmem:[#allocation2 + $0xf0] sm:$0xf]  ;;  %v1800_v10 = vld [vmem:[#allocation2 + $0xf4] sm:$0xf0]  ;;  %705 = vmatpush.bf16.msra.mxu0 %v1304_v3  ;;  %v1423_v14 = vld [vmem:[#allocation2 + $0x160] sm:$0xf]  ;;  %v1296_v16 = vor.u32 %v1782_v13, %v1295_v11 }
  0x18   :  { %v1368_v12 = vor.u32 %v1800_v10, %v1367_v9  ;;  %v1814_v15 = vld [vmem:[#allocation2 + $0x164] sm:$0xf0]  ;;  %731 = vmatpush.bf16.msra.mxu2 %v1432_v7  ;;  %v1487_v18 = vld [vmem:[#allocation2 + $0x1e0] sm:$0xf]  ;;  %v1287_v23 = vld [vmem:[#allocation2 + $0x50] sm:$0xf] }
  0x19   :  { %744 = vmatpush.bf16.msra.mxu3 %v1496_v8  ;;  %v1424_v17 = vor.u32 %v1814_v15, %v1423_v14  ;;  %v1830_v19 = vld [vmem:[#allocation2 + $0x1e4] sm:$0xf0]  ;;  %v1359_v20 = vld [vmem:[#allocation2 + $0xe0] sm:$0xf]  ;;  %v1780_v24 = vld [vmem:[#allocation2 + $0x54] sm:$0xf0] }
  0x1a   :  { %718 = vmatpush.bf16.msra.mxu1 %v1368_v12  ;;  %v1488_v21 = vor.u32 %v1830_v19, %v1487_v18  ;;  %v1798_v22 = vld [vmem:[#allocation2 + $0xe4] sm:$0xf0]  ;;  %v1415_v26 = vld [vmem:[#allocation2 + $0x150] sm:$0xf]  ;;  %v1812_v27 = vld [vmem:[#allocation2 + $0x154] sm:$0xf0]  ;;  %v1288_v29 = vor.u32 %v1780_v24, %v1287_v23 }
  0x1b   :  { %v1360_v25 = vor.u32 %v1798_v22, %v1359_v20  ;;  %v1479_v28 = vld [vmem:[#allocation2 + $0x1d0] sm:$0xf]  ;;  %706 = vmatpush.bf16.msra.mxu0 %v1296_v16  ;;  %v1828_v30 = vld [vmem:[#allocation2 + $0x1d4] sm:$0xf0]  ;;  %v1416_v33 = vor.u32 %v1812_v27, %v1415_v26  ;;  %v1279_v35 = vld [vmem:[#allocation2 + $0x40] sm:$0xf] }
  0x1c   :  { %v1351_v31 = vld [vmem:[#allocation2 + $0xd0] sm:$0xf]  ;;  %v1796_v32 = vld [vmem:[#allocation2 + $0xd4] sm:$0xf0]  ;;  %732 = vmatpush.bf16.msra.mxu2 %v1424_v17  ;;  %v1480_v34 = vor.u32 %v1828_v30, %v1479_v28  ;;  %v1778_v36 = vld [vmem:[#allocation2 + $0x44] sm:$0xf0] }
  0x1d   :  { %745 = vmatpush.bf16.msra.mxu3 %v1488_v21  ;;  %v1407_v37 = vld [vmem:[#allocation2 + $0x140] sm:$0xf]  ;;  %v1352_v38 = vor.u32 %v1796_v32, %v1351_v31  ;;  %v1810_v39 = vld [vmem:[#allocation2 + $0x144] sm:$0xf0]  ;;  %v1280_v44 = vor.u32 %v1778_v36, %v1279_v35  ;;  %v1271_v47 = vld [vmem:[#allocation2 + $0x30] sm:$0xf] }
  0x1e   :  { %719 = vmatpush.bf16.msra.mxu1 %v1360_v25  ;;  %v1471_v40 = vld [vmem:[#allocation2 + $0x1c0] sm:$0xf]  ;;  %v1826_v41 = vld [vmem:[#allocation2 + $0x1c4] sm:$0xf0]  ;;  %v1408_v45 = vor.u32 %v1810_v39, %v1407_v37  ;;  %v1776_v48 = vld [vmem:[#allocation2 + $0x34] sm:$0xf0] }
  0x1f   :  { %v1343_v42 = vld [vmem:[#allocation2 + $0xc0] sm:$0xf]  ;;  %v1794_v43 = vld [vmem:[#allocation2 + $0xc4] sm:$0xf0]  ;;  %707 = vmatpush.bf16.msra.mxu0 %v1288_v29  ;;  %v1472_v46 = vor.u32 %v1826_v41, %v1471_v40  ;;  %v1399_v49 = vld [vmem:[#allocation2 + $0x130] sm:$0xf]  ;;  %v1272_v56 = vor.u32 %v1776_v48, %v1271_v47 }
  0x20   :  { %733 = vmatpush.bf16.msra.mxu2 %v1416_v33  ;;  %v1344_v50 = vor.u32 %v1794_v43, %v1343_v42  ;;  %v1808_v51 = vld [vmem:[#allocation2 + $0x134] sm:$0xf0]  ;;  %v1463_v52 = vld [vmem:[#allocation2 + $0x1b0] sm:$0xf]  ;;  %v1263_v59 = vld [vmem:[#allocation2 + $0x20] sm:$0xf] }
  0x21   :  { %746 = vmatpush.bf16.msra.mxu3 %v1480_v34  ;;  %v1824_v53 = vld [vmem:[#allocation2 + $0x1b4] sm:$0xf0]  ;;  %v1335_v54 = vld [vmem:[#allocation2 + $0xb0] sm:$0xf]  ;;  %v1400_v57 = vor.u32 %v1808_v51, %v1399_v49  ;;  %v1774_v60 = vld [vmem:[#allocation2 + $0x24] sm:$0xf0] }
  0x22   :  { %720 = vmatpush.bf16.msra.mxu1 %v1352_v38  ;;  %v1792_v55 = vld [vmem:[#allocation2 + $0xb4] sm:$0xf0]  ;;  %v1464_v58 = vor.u32 %v1824_v53, %v1463_v52  ;;  %v1391_v61 = vld [vmem:[#allocation2 + $0x120] sm:$0xf]  ;;  %v1806_v63 = vld [vmem:[#allocation2 + $0x124] sm:$0xf0]  ;;  %v1264_v4 = vor.u32 %v1774_v60, %v1263_v59 }
  0x23   :  { %708 = vmatpush.bf16.msra.mxu0 %v1280_v44  ;;  %v1336_v62 = vor.u32 %v1792_v55, %v1335_v54  ;;  %v1455_v0 = vld [vmem:[#allocation2 + $0x1a0] sm:$0xf]  ;;  %v1822_v1 = vld [vmem:[#allocation2 + $0x1a4] sm:$0xf0]  ;;  %v1392_v5 = vor.u32 %v1806_v63, %v1391_v61  ;;  %v1255_v7 = vld [vmem:[#allocation2 + $0x10] sm:$0xf] }
  0x24   :  { %734 = vmatpush.bf16.msra.mxu2 %v1408_v45  ;;  %v1327_v2 = vld [vmem:[#allocation2 + $0xa0] sm:$0xf]  ;;  %v1790_v3 = vld [vmem:[#allocation2 + $0xa4] sm:$0xf0]  ;;  %v1456_v6 = vor.u32 %v1822_v1, %v1455_v0  ;;  %v1772_v8 = vld [vmem:[#allocation2 + $0x14] sm:$0xf0] }
  0x25   :  { %747 = vmatpush.bf16.msra.mxu3 %v1472_v46  ;;  %v1383_v9 = vld [vmem:[#allocation2 + $0x110] sm:$0xf]  ;;  %v1328_v10 = vor.u32 %v1790_v3, %v1327_v2  ;;  %v1804_v11 = vld [vmem:[#allocation2 + $0x114] sm:$0xf0]  ;;  %v1256_v16 = vor.u32 %v1772_v8, %v1255_v7  ;;  %v1247_v17 = vld [vmem:[#allocation2] sm:$0xf] }
  0x26   :  { %721 = vmatpush.bf16.msra.mxu1 %v1344_v50  ;;  %v1447_v12 = vld [vmem:[#allocation2 + $0x190] sm:$0xf]  ;;  %v1820_v13 = vld [vmem:[#allocation2 + $0x194] sm:$0xf0]  ;;  %v1770_v18 = vld [vmem:[#allocation2 + $0x4] sm:$0xf0]  ;;  %v1384_v20 = vor.u32 %v1804_v11, %v1383_v9 }
  0x27   :  { %709 = vmatpush.bf16.msra.mxu0 %v1272_v56  ;;  %v1319_v14 = vld [vmem:[#allocation2 + $0x90] sm:$0xf]  ;;  %v1788_v15 = vld [vmem:[#allocation2 + $0x94] sm:$0xf0]  ;;  %v1375_v19 = vld [vmem:[#allocation2 + $0x100] sm:$0xf]  ;;  %v1448_v21 = vor.u32 %v1820_v13, %v1447_v12  ;;  %v1248_v32 = vor.u32 %v1770_v18, %v1247_v17 }
  0x28   :  { %735 = vmatpush.bf16.msra.mxu2 %v1400_v57  ;;  %v1802_v22 = vld [vmem:[#allocation2 + $0x104] sm:$0xf0]  ;;  %v1439_v23 = vld [vmem:[#allocation2 + $0x180] sm:$0xf]  ;;  %v1320_v25 = vor.u32 %v1788_v15, %v1319_v14  ;;  %v1559_v26 = vld [vmem:[#allocation2 + $0x270] sm:$0xf] }
  0x29   :  { %748 = vmatpush.bf16.msra.mxu3 %v1464_v58  ;;  %v1818_v24 = vld [vmem:[#allocation2 + $0x184] sm:$0xf0]  ;;  %v1848_v27 = vld [vmem:[#allocation2 + $0x274] sm:$0xf0]  ;;  %v1783_v28 = vld [vmem:[#allocation2 + $0x74] sm:$0xf]  ;;  %v1376_v36 = vor.u32 %v1802_v22, %v1375_v19 }
  0x2a   :  { %722 = vmatpush.bf16.msra.mxu1 %v1336_v62  ;;  %v1305_v29 = vld [vmem:[#allocation2 + $0x78] sm:$0xf0]  ;;  %v1311_v30 = vld [vmem:[#allocation2 + $0x80] sm:$0xf]  ;;  %v1786_v31 = vld [vmem:[#allocation2 + $0x84] sm:$0xf0]  ;;  %v1440_v37 = vor.u32 %v1818_v24, %v1439_v23  ;;  %v1560_v41 = vor.u32 %v1848_v27, %v1559_v26 }
  0x2b   :  { %710 = vmatpush.bf16.msra.mxu0 %v1264_v4  ;;  %v96_v33 = vld [vmem:[%s2187_s0 + $0x10] sm:$0xff]  ;;  %v1631_v34 = vld [vmem:[#allocation2 + $0x300] sm:$0xf]  ;;  %v1866_v35 = vld [vmem:[#allocation2 + $0x304] sm:$0xf0]  ;;  %v1308_v42 = vor.u32 %v1783_v28, %v1305_v29  ;;  %v1312_v46 = vor.u32 %v1786_v31, %v1311_v30  ;;  %vm701_vm0 = vcmask 130048  }
  0x2c   :  { %736 = vmatpush.bf16.msra.mxu2 %v1392_v5  ;;  %v1623_v38 = vld [vmem:[#allocation2 + $0x2f0] sm:$0xf]  ;;  %v1864_v39 = vld [vmem:[#allocation2 + $0x2f4] sm:$0xf0]  ;;  %v1799_v40 = vld [vmem:[#allocation2 + $0xf4] sm:$0xf]  ;;  %v1632_v47 = vor.u32 %v1866_v35, %v1631_v34  ;;  %v2103_v51 = vpack.c.bf16 %v96_v33, %v96_v33 }
  0x2d   :  { %749 = vmatpush.bf16.msra.mxu3 %v1456_v6  ;;  %v1369_v43 = vld [vmem:[#allocation2 + $0xf8] sm:$0xf0]  ;;  %v1551_v44 = vld [vmem:[#allocation2 + $0x260] sm:$0xf]  ;;  %v1846_v48 = vld [vmem:[#allocation2 + $0x264] sm:$0xf0]  ;;  %v1624_v52 = vor.u32 %v1864_v39, %v1623_v38 }
  0x2e   :  { %723 = vmatpush.bf16.msra.mxu1 %v1328_v10  ;;  %v94_v45 = vld [vmem:[%s2187_s0] sm:$0xff]  ;;  %v1297_v50 = vld [vmem:[#allocation2 + $0x68] sm:$0xf0]  ;;  %v97_v53 = vld [vmem:[%s2187_s0 + $0x18] sm:$0xff]  ;;  %v1372_v55 = vor.u32 %v1799_v40, %v1369_v43  ;;  %v1552_v59 = vor.u32 %v1846_v48, %v1551_v44  ;;  %vm1158_vm1 = vcmask 523264   ;;  %s1233_s10 = sshll.u32 %s2194_s7, 4  ;;  %s1234_s10 = int_to_ptr.hbm [resolvable:$true] %s1233_s10 }
  0x2f   :  { %711 = vmatpush.bf16.msra.mxu0 %v1256_v16  ;;  %v1781_v49 = vld [vmem:[#allocation2 + $0x64] sm:$0xf]  ;;  %v95_v54 = vld [vmem:[%s2187_s0 + $0x8] sm:$0xff]  ;;  %v1615_v56 = vld [vmem:[#allocation2 + $0x2e0] sm:$0xf]  ;;  %v2111_v58 = vpack.c.bf16 %v94_v45, %v94_v45  ;;  %v2113_v3 = vpack.c.bf16 %v97_v53, %v97_v53 }
  0x30   :  { %737 = vmatpush.bf16.msra.mxu2 %v1384_v20  ;;  %v1862_v57 = vld [vmem:[#allocation2 + $0x2e4] sm:$0xf0]  ;;  %v1300_v60 = vor.u32 %v1781_v49, %v1297_v50  ;;  %v1797_v61 = vld [vmem:[#allocation2 + $0xe4] sm:$0xf]  ;;  %v1361_v62 = vld [vmem:[#allocation2 + $0xe8] sm:$0xf0]  ;;  %v2115_v4 = vpack.c.bf16 %v95_v54, %v95_v54 }
  0x31   :  { %750 = vmatpush.bf16.msra.mxu3 %v1448_v21  ;;  %v1543_v63 = vld [vmem:[#allocation2 + $0x250] sm:$0xf]  ;;  %v1844_v0 = vld [vmem:[#allocation2 + $0x254] sm:$0xf0]  ;;  %v1779_v1 = vld [vmem:[#allocation2 + $0x54] sm:$0xf]  ;;  %v1616_v5 = vor.u32 %v1862_v57, %v1615_v56  ;;  %v1364_v6 = vor.u32 %v1797_v61, %v1361_v62 }
  0x32   :  { %724 = vmatpush.bf16.msra.mxu1 %v1320_v25  ;;  %v1289_v2 = vld [vmem:[#allocation2 + $0x58] sm:$0xf0]  ;;  %v1607_v7 = vld [vmem:[#allocation2 + $0x2d0] sm:$0xf]  ;;  %v1860_v8 = vld [vmem:[#allocation2 + $0x2d4] sm:$0xf0]  ;;  %v1544_v9 = vor.u32 %v1844_v0, %v1543_v63 }
  0x33   :  { %712 = vmatpush.bf16.msra.mxu0 %v1248_v32  ;;  %v1292_v10 = vor.u32 %v1779_v1, %v1289_v2  ;;  %v1795_v11 = vld [vmem:[#allocation2 + $0xd4] sm:$0xf]  ;;  %v1353_v12 = vld [vmem:[#allocation2 + $0xd8] sm:$0xf0]  ;;  %v1535_v13 = vld [vmem:[#allocation2 + $0x240] sm:$0xf]  ;;  %v1608_v17 = vor.u32 %v1860_v8, %v1607_v7 }
  0x34   :  { %738 = vmatpush.bf16.msra.mxu2 %v1376_v36  ;;  %v1842_v14 = vld [vmem:[#allocation2 + $0x244] sm:$0xf0]  ;;  %v1777_v15 = vld [vmem:[#allocation2 + $0x44] sm:$0xf]  ;;  %v1281_v16 = vld [vmem:[#allocation2 + $0x48] sm:$0xf0]  ;;  %v1356_v18 = vor.u32 %v1795_v11, %v1353_v12 }
  0x35   :  { %751 = vmatpush.bf16.msra.mxu3 %v1440_v37  ;;  %v1599_v19 = vld [vmem:[#allocation2 + $0x2c0] sm:$0xf]  ;;  %v1858_v20 = vld [vmem:[#allocation2 + $0x2c4] sm:$0xf0]  ;;  %v1536_v21 = vor.u32 %v1842_v14, %v1535_v13  ;;  %v1284_v22 = vor.u32 %v1777_v15, %v1281_v16  ;;  %v1793_v23 = vld [vmem:[#allocation2 + $0xc4] sm:$0xf] }
  0x36   :  { %725 = vmatpush.bf16.msra.mxu1 %v1312_v46  ;;  %713 = vmatmul.bf16.vlgmr.msra.gmra.mxu0 %v2111_v58  ;;  %v1345_v24 = vld [vmem:[#allocation2 + $0xc8] sm:$0xf0]  ;;  %v1527_v25 = vld [vmem:[#allocation2 + $0x230] sm:$0xf]  ;;  %v1840_v26 = vld [vmem:[#allocation2 + $0x234] sm:$0xf0]  ;;  %v1600_v29 = vor.u32 %v1858_v20, %v1599_v19 }
  0x37   :  { %757 = vmatpush.bf16.msrb.mxu0 %v1560_v41  ;;  %739 = vmatmul.bf16.vlgmr.msra.gmra.mxu2 %v2103_v51  ;;  %v1775_v27 = vld [vmem:[#allocation2 + $0x34] sm:$0xf]  ;;  %v1273_v28 = vld [vmem:[#allocation2 + $0x38] sm:$0xf0]  ;;  %v1348_v30 = vor.u32 %v1793_v23, %v1345_v24  ;;  %v1591_v31 = vld [vmem:[#allocation2 + $0x2b0] sm:$0xf]  ;;  %v1528_v34 = vor.u32 %v1840_v26, %v1527_v25 }
  0x38   :  { %790 = vmatpush.bf16.msrb.mxu2 %v1632_v47  ;;  %752 = vmatmul.bf16.vlgmr.msra.gmra.mxu3 %v2113_v3  ;;  %v1856_v32 = vld [vmem:[#allocation2 + $0x2b4] sm:$0xf0]  ;;  %v100_v33 = vld [vmem:[%s2187_s0 + $0x30] sm:$0xff]  ;;  %v1276_v35 = vor.u32 %v1775_v27, %v1273_v28  ;;  %v1337_v37 = vld [vmem:[#allocation2 + $0xb8] sm:$0xf0] }
  0x39   :  { %796 = vmatpush.bf16.msrb.mxu3 %v1308_v42  ;;  %726 = vmatmul.bf16.vlgmr.msra.gmra.mxu1 %v2115_v4  ;;  %v1791_v36 = vld [vmem:[#allocation2 + $0xb4] sm:$0xf]  ;;  %v1519_v38 = vld [vmem:[#allocation2 + $0x220] sm:$0xf]  ;;  %v1838_v39 = vld [vmem:[#allocation2 + $0x224] sm:$0xf0]  ;;  %v1592_v42 = vor.u32 %v1856_v32, %v1591_v31  ;;  %v2124_v43 = vpack.c.bf16 %v100_v33, %v100_v33 }
  0x3a   :  { %770 = vmatpush.bf16.msrb.mxu1 %v1624_v52  ;;  %v1773_v40 = vld [vmem:[#allocation2 + $0x24] sm:$0xf]  ;;  %v1265_v41 = vld [vmem:[#allocation2 + $0x28] sm:$0xf0]  ;;  %v1340_v44 = vor.u32 %v1791_v36, %v1337_v37  ;;  %v1583_v45 = vld [vmem:[#allocation2 + $0x2a0] sm:$0xf]  ;;  %v1520_v47 = vor.u32 %v1838_v39, %v1519_v38 }
  0x3b   :  { %758 = vmatpush.bf16.msrb.mxu0 %v1552_v59  ;;  %v1854_v46 = vld [vmem:[#allocation2 + $0x2a4] sm:$0xf0]  ;;  %v1268_v48 = vor.u32 %v1773_v40, %v1265_v41  ;;  %v1789_v49 = vld [vmem:[#allocation2 + $0xa4] sm:$0xf]  ;;  %v1329_v50 = vld [vmem:[#allocation2 + $0xa8] sm:$0xf0] }
  0x3c   :  { %809 = vmatpush.bf16.msra.mxu2 %v1372_v55  ;;  %v1511_v52 = vld [vmem:[#allocation2 + $0x210] sm:$0xf]  ;;  %v1836_v53 = vld [vmem:[#allocation2 + $0x214] sm:$0xf0]  ;;  %v1771_v54 = vld [vmem:[#allocation2 + $0x14] sm:$0xf]  ;;  %v1584_v56 = vor.u32 %v1854_v46, %v1583_v45  ;;  %v1332_v57 = vor.u32 %v1789_v49, %v1329_v50 }
  0x3d   :  { %797 = vmatpush.bf16.msrb.mxu3 %v1300_v60  ;;  %v1257_v55 = vld [vmem:[#allocation2 + $0x18] sm:$0xf0]  ;;  %v1575_v59 = vld [vmem:[#allocation2 + $0x290] sm:$0xf]  ;;  %v1852_v60 = vld [vmem:[#allocation2 + $0x294] sm:$0xf0]  ;;  %v1512_v62 = vor.u32 %v1836_v53, %v1511_v52 }
  0x3e   :  { %771 = vmatpush.bf16.msrb.mxu1 %v1616_v5  ;;  %v1787_v61 = vld [vmem:[#allocation2 + $0x94] sm:$0xf]  ;;  %v1260_v63 = vor.u32 %v1771_v54, %v1257_v55  ;;  %v1321_v0 = vld [vmem:[#allocation2 + $0x98] sm:$0xf0]  ;;  %v1503_v1 = vld [vmem:[#allocation2 + $0x200] sm:$0xf]  ;;  %v1576_v8 = vor.u32 %v1852_v60, %v1575_v59 }
  0x3f   :  { %759 = vmatpush.bf16.msrb.mxu0 %v1544_v9  ;;  %v1834_v2 = vld [vmem:[#allocation2 + $0x204] sm:$0xf0]  ;;  %v1769_v5 = vld [vmem:[#allocation2 + $0x4] sm:$0xf]  ;;  %v1815_v7 = vld [vmem:[#allocation2 + $0x174] sm:$0xf]  ;;  %v1324_v12 = vor.u32 %v1787_v61, %v1321_v0 }
  0x40   :  { %810 = vmatpush.bf16.msra.mxu2 %v1364_v6  ;;  %v1249_v6 = vld [vmem:[#allocation2 + $0x8] sm:$0xf0]  ;;  %v1433_v9 = vld [vmem:[#allocation2 + $0x178] sm:$0xf0]  ;;  %v1567_v13 = vld [vmem:[#allocation2 + $0x280] sm:$0xf]  ;;  %v1504_v16 = vor.u32 %v1834_v2, %v1503_v1 }
  0x41   :  { %798 = vmatpush.bf16.msrb.mxu3 %v1292_v10  ;;  %v1847_v10 = vld [vmem:[#allocation2 + $0x274] sm:$0xf]  ;;  %v1561_v11 = vld [vmem:[#allocation2 + $0x278] sm:$0xf0]  ;;  %v1850_v14 = vld [vmem:[#allocation2 + $0x284] sm:$0xf0] }
  0x42   :  { %772 = vmatpush.bf16.msrb.mxu1 %v1608_v17  ;;  %v98_v15 = vld [vmem:[%s2187_s0 + $0x20] sm:$0xff]  ;;  %v1252_v17 = vor.u32 %v1769_v5, %v1249_v6  ;;  %v1313_v19 = vld [vmem:[#allocation2 + $0x88] sm:$0xf0]  ;;  %v1831_v20 = vld [vmem:[#allocation2 + $0x1f4] sm:$0xf]  ;;  %v1568_v26 = vor.u32 %v1850_v14, %v1567_v13 }
  0x43   :  { %760 = vmatpush.bf16.msrb.mxu0 %v1536_v21  ;;  %v1436_v21 = vor.u32 %v1815_v7, %v1433_v9  ;;  %v1497_v23 = vld [vmem:[#allocation2 + $0x1f8] sm:$0xf0]  ;;  %v1863_v24 = vld [vmem:[#allocation2 + $0x2f4] sm:$0xf]  ;;  %v99_v27 = vld [vmem:[%s2187_s0 + $0x28] sm:$0xff] }
  0x44   :  { %811 = vmatpush.bf16.msra.mxu2 %v1356_v18  ;;  %v1785_v18 = vld [vmem:[#allocation2 + $0x84] sm:$0xf]  ;;  %v1625_v25 = vld [vmem:[#allocation2 + $0x2f8] sm:$0xf0]  ;;  %v1553_v33 = vld [vmem:[#allocation2 + $0x268] sm:$0xf0]  ;;  %v2136_v37 = vpack.c.bf16 %v99_v27, %v99_v27 }
  0x45   :  { %799 = vmatpush.bf16.msrb.mxu3 %v1284_v22  ;;  %v1564_v22 = vor.u32 %v1847_v10, %v1561_v11  ;;  %v1813_v28 = vld [vmem:[#allocation2 + $0x164] sm:$0xf]  ;;  %v1316_v31 = vor.u32 %v1785_v18, %v1313_v19  ;;  %v1489_v39 = vld [vmem:[#allocation2 + $0x1e8] sm:$0xf0]  ;;  %v1417_v45 = vld [vmem:[#allocation2 + $0x158] sm:$0xf0] }
  0x46   :  { %773 = vmatpush.bf16.msrb.mxu1 %v1600_v29  ;;  %v1425_v29 = vld [vmem:[#allocation2 + $0x168] sm:$0xf0]  ;;  %v1845_v32 = vld [vmem:[#allocation2 + $0x264] sm:$0xf]  ;;  %v1843_v46 = vld [vmem:[#allocation2 + $0x254] sm:$0xf] }
  0x47   :  { %761 = vmatpush.bf16.msrb.mxu0 %v1528_v34  ;;  %1637 = vmatmul.msk.bf16.vlgmr.msrb.gmra.mxu2 %vm701_vm0, %v2124_v43  ;;  %v1500_v34 = vor.u32 %v1831_v20, %v1497_v23  ;;  %v1829_v36 = vld [vmem:[#allocation2 + $0x1e4] sm:$0xf]  ;;  %v1428_v38 = vor.u32 %v1813_v28, %v1425_v29  ;;  %v1617_v41 = vld [vmem:[#allocation2 + $0x2e8] sm:$0xf0]  ;;  %v1827_v50 = vld [vmem:[#allocation2 + $0x1d4] sm:$0xf] }
  0x48   :  { %812 = vmatpush.bf16.msra.mxu2 %v1348_v30  ;;  %v2134_v30 = vpack.c.bf16 %v98_v15, %v98_v15  ;;  %v1861_v40 = vld [vmem:[#allocation2 + $0x2e4] sm:$0xf]  ;;  %v1481_v53 = vld [vmem:[#allocation2 + $0x1d8] sm:$0xf0]  ;;  %v1859_v54 = vld [vmem:[#allocation2 + $0x2d4] sm:$0xf] }
  0x49   :  { %800 = vmatpush.bf16.msrb.mxu3 %v1276_v35  ;;  %v1628_v35 = vor.u32 %v1863_v24, %v1625_v25  ;;  %v1620_v49 = vor.u32 %v1861_v40, %v1617_v41  ;;  %v1609_v55 = vld [vmem:[#allocation2 + $0x2d8] sm:$0xf0]  ;;  %v1409_v59 = vld [vmem:[#allocation2 + $0x148] sm:$0xf0]  ;;  %v1841_v60 = vld [vmem:[#allocation2 + $0x244] sm:$0xf] }
  0x4a   :  { %774 = vmatpush.bf16.msrb.mxu1 %v1592_v42  ;;  %v1556_v42 = vor.u32 %v1845_v32, %v1553_v33  ;;  %v1537_v61 = vld [vmem:[#allocation2 + $0x248] sm:$0xf0]  ;;  %v1825_v0 = vld [vmem:[#allocation2 + $0x1c4] sm:$0xf]  ;;  %v1401_v9 = vld [vmem:[#allocation2 + $0x138] sm:$0xf0] }
  0x4b   :  { %762 = vmatpush.bf16.msrb.mxu0 %v1520_v47  ;;  %v1545_v47 = vld [vmem:[#allocation2 + $0x258] sm:$0xf0]  ;;  %v1473_v2 = vld [vmem:[#allocation2 + $0x1c8] sm:$0xf0]  ;;  %v1857_v5 = vld [vmem:[#allocation2 + $0x2c4] sm:$0xf]  ;;  %v1540_v7 = vor.u32 %v1841_v60, %v1537_v61 }
  0x4c   :  { %813 = vmatpush.bf16.msra.mxu2 %v1340_v44  ;;  %v1811_v44 = vld [vmem:[#allocation2 + $0x154] sm:$0xf]  ;;  %v1601_v6 = vld [vmem:[#allocation2 + $0x2c8] sm:$0xf0]  ;;  %v1476_v11 = vor.u32 %v1825_v0, %v1473_v2  ;;  %v1465_v14 = vld [vmem:[#allocation2 + $0x1b8] sm:$0xf0] }
  0x4d   :  { %801 = vmatpush.bf16.msrb.mxu3 %v1268_v48  ;;  %v1492_v48 = vor.u32 %v1829_v36, %v1489_v39  ;;  %v1420_v52 = vor.u32 %v1811_v44, %v1417_v45  ;;  %v1839_v10 = vld [vmem:[#allocation2 + $0x234] sm:$0xf]  ;;  %v1805_v18 = vld [vmem:[#allocation2 + $0x124] sm:$0xf]  ;;  %v1393_v19 = vld [vmem:[#allocation2 + $0x128] sm:$0xf0] }
  0x4e   :  { %775 = vmatpush.bf16.msrb.mxu1 %v1584_v56  ;;  %v1548_v56 = vor.u32 %v1843_v46, %v1545_v47  ;;  %v1855_v15 = vld [vmem:[#allocation2 + $0x2b4] sm:$0xf]  ;;  %v1837_v20 = vld [vmem:[#allocation2 + $0x224] sm:$0xf]  ;;  %v1396_v25 = vor.u32 %v1805_v18, %v1393_v19  ;;  %v1585_v28 = vld [vmem:[#allocation2 + $0x2a8] sm:$0xf0] }
  0x4f   :  { %763 = vmatpush.bf16.msrb.mxu0 %v1512_v62  ;;  %v1484_v62 = vor.u32 %v1827_v50, %v1481_v53  ;;  %v1821_v24 = vld [vmem:[#allocation2 + $0x1a4] sm:$0xf]  ;;  %v1385_v32 = vld [vmem:[#allocation2 + $0x118] sm:$0xf0]  ;;  %v1835_v33 = vld [vmem:[#allocation2 + $0x214] sm:$0xf] }
  0x50   :  { %814 = vmatpush.bf16.msra.mxu2 %v1332_v57  ;;  %v1809_v57 = vld [vmem:[#allocation2 + $0x144] sm:$0xf]  ;;  %v1449_v40 = vld [vmem:[#allocation2 + $0x198] sm:$0xf0]  ;;  %v1851_v41 = vld [vmem:[#allocation2 + $0x294] sm:$0xf] }
  0x51   :  { %802 = vmatpush.bf16.msrb.mxu3 %v1260_v63  ;;  %v1612_v63 = vor.u32 %v1859_v54, %v1609_v55  ;;  %v1412_v1 = vor.u32 %v1809_v57, %v1409_v59  ;;  %v1853_v27 = vld [vmem:[#allocation2 + $0x2a4] sm:$0xf]  ;;  %v1377_v46 = vld [vmem:[#allocation2 + $0x108] sm:$0xf0]  ;;  %v1872_v2 = vld [vmem:[#allocation5 + $0x28] sm:$0xff] }
  0x52   :  { %776 = vmatpush.bf16.msrb.mxu1 %v1576_v8  ;;  %v1807_v8 = vld [vmem:[#allocation2 + $0x134] sm:$0xf]  ;;  %v1588_v36 = vor.u32 %v1853_v27, %v1585_v28  ;;  %v1801_v45 = vld [vmem:[#allocation2 + $0x104] sm:$0xf]  ;;  %v1633_v50 = vld [vmem:[#allocation2 + $0x308] sm:$0xf0] }
  0x53   :  { %764 = vmatpush.bf16.msrb.mxu0 %v1504_v16  ;;  %v1404_v13 = vor.u32 %v1807_v8, %v1401_v9  ;;  %v1593_v16 = vld [vmem:[#allocation2 + $0x2b8] sm:$0xf0]  ;;  %v1833_v47 = vld [vmem:[#allocation2 + $0x204] sm:$0xf]  ;;  %v1380_v54 = vor.u32 %v1801_v45, %v1377_v46  ;;  %v1569_v60 = vld [vmem:[#allocation2 + $0x288] sm:$0xf0] }
  0x54   :  { %815 = vmatpush.bf16.msra.mxu2 %v1324_v12  ;;  %v1823_v12 = vld [vmem:[#allocation2 + $0x1b4] sm:$0xf]  ;;  %v1596_v23 = vor.u32 %v1855_v15, %v1593_v16  ;;  %v1817_v55 = vld [vmem:[#allocation2 + $0x184] sm:$0xf]  ;;  %v1874_v0 = vld [vmem:[#allocation5 + $0x38] sm:$0xff] }
  0x55   :  { %803 = vmatpush.bf16.msrb.mxu3 %v1252_v17  ;;  %v1849_v59 = vld [vmem:[#allocation2 + $0x284] sm:$0xf]  ;;  %v1880_v19 = vld [vmem:[#allocation5 + $0x68] sm:$0xff]  ;;  %v1878_v27 = vld [vmem:[#allocation5 + $0x58] sm:$0xff] }
  0x56   :  { %777 = vmatpush.bf16.msrb.mxu1 %v1568_v26  ;;  %765 = vmatmul.bf16.vlgmr.msrb.gmra.mxu0 %v2134_v30  ;;  %v1457_v26 = vld [vmem:[#allocation2 + $0x1a8] sm:$0xf0] }
  0x57   :  { %822 = vmatpush.bf16.msra.mxu0 %v1436_v21  ;;  %v1521_v21 = vld [vmem:[#allocation2 + $0x228] sm:$0xf0] }
  0x58   :  { %816 = vmatpush.bf16.msra.mxu2 %v1316_v31  ;;  %804 = vmatmul.bf16.vlgmr.msrb.gmra.mxu3 %v2111_v58  ;;  %v1604_v58 = vor.u32 %v1857_v5, %v1601_v6  ;;  %v1524_v29 = vor.u32 %v1837_v20, %v1521_v21  ;;  %v1803_v31 = vld [vmem:[#allocation2 + $0x114] sm:$0xf]  ;;  %v1870_v6 = vld [vmem:[#allocation5 + $0x18] sm:$0xff] }
  0x59   :  { %848 = vmatpush.bf16.msra.mxu3 %v1564_v22  ;;  %778 = vmatmul.bf16.vlgmr.msrb.gmra.mxu1 %v2136_v37  ;;  %v1468_v22 = vor.u32 %v1823_v12, %v1465_v14  ;;  %v1388_v39 = vor.u32 %v1803_v31, %v1385_v32  ;;  %v1871_v5 = vld [vmem:[#allocation5 + $0x20] sm:$0xff]  ;;  %v1877_v32 = vld [vmem:[#allocation5 + $0x50] sm:$0xff] }
  0x5a   :  { %835 = vmatpush.bf16.msra.mxu1 %v1500_v34  ;;  %v1513_v34 = vld [vmem:[#allocation2 + $0x218] sm:$0xf0] }
  0x5b   :  { %823 = vmatpush.bf16.msra.mxu0 %v1428_v38  ;;  %817 = vmatmul.bf16.vlgmr.msra.gmra.mxu2 %v2115_v4  ;;  %v1529_v4 = vld [vmem:[#allocation2 + $0x238] sm:$0xf0]  ;;  %v1819_v38 = vld [vmem:[#allocation2 + $0x194] sm:$0xf]  ;;  %v1516_v44 = vor.u32 %v1835_v33, %v1513_v34 }
  0x5c   :  { %861 = vmatpush.bf16.msrb.mxu2 %v1628_v35  ;;  %v1532_v17 = vor.u32 %v1839_v10, %v1529_v4  ;;  %v1460_v35 = vor.u32 %v1821_v24, %v1457_v26  ;;  %v1882_v4 = vld [vmem:[#allocation5 + $0x78] sm:$0xff] }
  0x5d   :  { %849 = vmatpush.bf16.msra.mxu3 %v1556_v42  ;;  %v1577_v42 = vld [vmem:[#allocation2 + $0x298] sm:$0xf0] }
  0x5e   :  { %836 = vmatpush.bf16.msra.mxu1 %v1492_v48  ;;  %v1505_v48 = vld [vmem:[#allocation2 + $0x208] sm:$0xf0]  ;;  %v1580_v53 = vor.u32 %v1851_v41, %v1577_v42 }
  0x5f   :  { %824 = vmatpush.bf16.msra.mxu0 %v1420_v52  ;;  %v1452_v52 = vor.u32 %v1819_v38, %v1449_v40  ;;  %v1508_v57 = vor.u32 %v1833_v47, %v1505_v48  ;;  %v1876_v38 = vld [vmem:[#allocation5 + $0x48] sm:$0xff] }
  0x60   :  { %862 = vmatpush.bf16.msrb.mxu2 %v1620_v49  ;;  %v1865_v49 = vld [vmem:[#allocation2 + $0x304] sm:$0xf] }
  0x61   :  { %850 = vmatpush.bf16.msra.mxu3 %v1548_v56  ;;  %v1441_v56 = vld [vmem:[#allocation2 + $0x188] sm:$0xf0]  ;;  %v1636_v61 = vor.u32 %v1865_v49, %v1633_v50 }
  0x62   :  { %837 = vmatpush.bf16.msra.mxu1 %v1484_v62  ;;  %v1444_v62 = vor.u32 %v1817_v55, %v1441_v56 }
  0x63   :  { %825 = vmatpush.bf16.msra.mxu0 %v1412_v1  ;;  %v1873_v1 = vld [vmem:[#allocation5 + $0x30] sm:$0xff] }
  0x64   :  { %863 = vmatpush.bf16.msrb.mxu2 %v1612_v63  ;;  %v1572_v63 = vor.u32 %v1849_v59, %v1569_v60 }
  0x65   :  { %851 = vmatpush.bf16.msra.mxu3 %v1540_v7 }
  0x66   :  { %838 = vmatpush.bf16.msra.mxu1 %v1476_v11 }
  0x67   :  { %826 = vmatpush.bf16.msra.mxu0 %v1404_v13  ;;  %v1881_v13 = vld [vmem:[#allocation5 + $0x70] sm:$0xff] }
  0x68   :  { %864 = vmatpush.bf16.msrb.mxu2 %v1604_v58 }
  0x69   :  { %852 = vmatpush.bf16.msra.mxu3 %v1532_v17 }
  0x6a   :  { %839 = vmatpush.bf16.msra.mxu1 %v1468_v22  ;;  %v1879_v22 = vld [vmem:[#allocation5 + $0x60] sm:$0xff] }
  0x6b   :  { %827 = vmatpush.bf16.msra.mxu0 %v1396_v25 }
  0x6c   :  { %865 = vmatpush.bf16.msrb.mxu2 %v1596_v23 }
  0x6d   :  { %853 = vmatpush.bf16.msra.mxu3 %v1524_v29 }
  0x6e   :  { %840 = vmatpush.bf16.msra.mxu1 %v1460_v35 }
  0x6f   :  { %828 = vmatpush.bf16.msra.mxu0 %v1388_v39  ;;  %v1875_v39 = vld [vmem:[#allocation5 + $0x40] sm:$0xff] }
  0x70   :  { %866 = vmatpush.bf16.msrb.mxu2 %v1588_v36 }
  0x71   :  { %854 = vmatpush.bf16.msra.mxu3 %v1516_v44 }
  0x72   :  { %841 = vmatpush.bf16.msra.mxu1 %v1452_v52 }
  0x73   :  { %829 = vmatpush.bf16.msra.mxu0 %v1380_v54 }
  0x74   :  { %867 = vmatpush.bf16.msrb.mxu2 %v1580_v53 }
  0x75   :  { %855 = vmatpush.bf16.msra.mxu3 %v1508_v57 }
  0x76   :  { %842 = vmatpush.bf16.msra.mxu1 %v1444_v62  ;;  %830 = vmatmul.bf16.vlgmr.msra.gmra.mxu0 %v2103_v51  ;;  %v1869_v51 = vld [vmem:[#allocation5 + $0x10] sm:$0xff] }
  0x77   :  { %881 = vmatpush.bf16.msrb.mxu0 %v1636_v61 }
  0x78   :  { %856 = vmatmul.bf16.vlgmr.msra.gmra.mxu3 %v2134_v30  ;;  %868 = vmatpush.bf16.msrb.mxu2 %v1572_v63  ;;  %v1868_v30 = vld [vmem:[#allocation5 + $0x8] sm:$0xff] }
  0x79   :  { %843 = vmatmul.bf16.vlgmr.msra.gmra.mxu1 %v2113_v3  ;;  %1032 = vmatpush.bf16.msrb.mxu3 %v1882_v4  ;;  %v90_v4 = vld [vmem:[#allocation8 + $0x1] ss:$0 sm:$0xff] }
  0x7a   :  { %1019 = vmatpush.bf16.msrb.mxu1 %v1874_v0 }
  0x7b   :  { %869 = vmatmul.bf16.vlgmr.msrb.gmra.mxu2 %v2136_v37  ;;  %v1867_v37 = vld [vmem:[#allocation5] sm:$0xff] }
  0x7d   :  { %1033 = vmatpush.bf16.msrb.mxu3 %v1881_v13 }
  0x7e   :  { %1020 = vmatpush.bf16.msrb.mxu1 %v1873_v1  ;;  %v1890_v1 = vld [vmem:[%s2190_s3 + $0x38] sm:$0xff] }
  0x7f   :  { %1111 = vmatpush.bf16.msra.mxu0 %v1890_v1 }
  0x81   :  { %1034 = vmatpush.bf16.msrb.mxu3 %v1880_v19  ;;  %v1896_v19 = vld [vmem:[#allocation7 + $0x8] sm:$0xff] }
  0x82   :  { %1021 = vmatpush.bf16.msrb.mxu1 %v1872_v2  ;;  %v1889_v2 = vld [vmem:[%s2190_s3 + $0x30] sm:$0xff] }
  0x83   :  { %1112 = vmatpush.bf16.msra.mxu0 %v1889_v2 }
  0x85   :  { %1035 = vmatpush.bf16.msrb.mxu3 %v1879_v22 }
  0x86   :  { %1638 = vmatmul.msk.bf16.vlgmr.msrb.gmra.mxu0 %vm701_vm0, %v2124_v43  ;;  %1022 = vmatpush.bf16.msrb.mxu1 %v1871_v5  ;;  %v89_v43 = vld [vmem:[#allocation8] ss:$8 sm:$0x3]  ;;  %v1888_v5 = vld [vmem:[%s2190_s3 + $0x28] sm:$0xff] }
  0x87   :  { %v207_v58 = vperm.slane %v89_v43, 0  ;;  %v208_v42 = vperm.slane %v89_v43, 1  ;;  %1113 = vmatpush.bf16.msra.mxu0 %v1888_v5  ;;  %v1894_v43 = vld [vmem:[%s2191_s4 + $0x18] sm:$0xff] }
  0x88   :  { %1166 = vmatpush.bf16.msra.mxu2 %v1894_v43 }
  0x89   :  { %1036 = vmatpush.bf16.msrb.mxu3 %v1878_v27  ;;  %v92_v27 = vld [vmem:[#allocation8 + $0x3] ss:$0 sm:$0xff] }
  0x8a   :  { %1023 = vmatpush.bf16.msrb.mxu1 %v1870_v6  ;;  %v1887_v6 = vld [vmem:[%s2190_s3 + $0x20] sm:$0xff] }
  0x8b   :  { %1114 = vmatpush.bf16.msra.mxu0 %v1887_v6 }
  0x8d   :  { %1037 = vmatpush.bf16.msrb.mxu3 %v1877_v32 }
  0x8e   :  { %1024 = vmatpush.bf16.msrb.mxu1 %v1869_v51  ;;  %v1886_v51 = vld [vmem:[%s2190_s3 + $0x18] sm:$0xff] }
  0x8f   :  { %1115 = vmatpush.bf16.msra.mxu0 %v1886_v51 }
  0x91   :  { %1038 = vmatpush.bf16.msrb.mxu3 %v1876_v38 }
  0x92   :  { %1025 = vmatpush.bf16.msrb.mxu1 %v1868_v30  ;;  %v1885_v30 = vld [vmem:[%s2190_s3 + $0x10] sm:$0xff] }
  0x93   :  { %1116 = vmatpush.bf16.msra.mxu0 %v1885_v30 }
  0x95   :  { %1039 = vmatpush.bf16.msrb.mxu3 %v1875_v39 }
  0x96   :  { %1026 = vmatpush.bf16.msrb.mxu1 %v1867_v37  ;;  %v1884_v37 = vld [vmem:[%s2190_s3 + $0x8] sm:$0xff] }
  0x97   :  { %1117 = vmatpush.bf16.msra.mxu0 %v1884_v37 }
  0xb3   :  { %v714_v7 = vpop.f32.mrf.mxu0 }
  0xb4   :  { %v715_v14 = vadd.f32 %v714_v7, %v207_v58 }
  0xb6   :  { %v727_v3 = vpop.f32.mrf.mxu1 }
  0xb7   :  { %v728_v16 = vadd.f32 %v727_v3, %v715_v14 }
  0xba   :  { %v740_v8 = vpop.f32.mrf.mxu2 }
  0xbb   :  { %v753_v9 = vpop.f32.mrf.mxu3  ;;  %v716_v10 = vpop.f32.mrf.mxu0  ;;  %v741_v18 = vadd.f32 %v740_v8, %v728_v16  ;;  %v1883_v8 = vld [vmem:[%s2190_s3] sm:$0xff] }
  0xbc   :  { %1118 = vmatpush.bf16.msra.mxu0 %v1883_v8  ;;  %v1892_v10 = vld [vmem:[%s2191_s4 + $0x8] sm:$0xff]  ;;  %v1891_v16 = vld [vmem:[%s2191_s4] sm:$0xff] }
  0xbd   :  { %v754_v20 = vadd.f32 %v753_v9, %v741_v18  ;;  %v1893_v9 = vld [vmem:[%s2191_s4 + $0x10] sm:$0xff]  ;;  %v1897_v18 = vld [vmem:[#allocation7 + $0x10] sm:$0xff]  ;;  %s2044_s4 = smov [#allocation10]  }
  0xbe   :  { %v729_v11 = vpop.f32.mrf.mxu1  ;;  %1167 = vmatpush.bf16.msra.mxu2 %v1893_v9  ;;  %s1231_s30 = sshll.u32 %s2044_s4, 4  ;;  %s1232_s30 = int_to_ptr.vmem [resolvable:$true] %s1231_s30 }
  0xc2   :  { %v742_v12 = vpop.f32.mrf.mxu2  ;;  %1168 = vmatpush.bf16.msra.mxu2 %v1892_v10 }
  0xc3   :  { %v755_v15 = vpop.f32.mrf.mxu3 }
  0xc6   :  { %1169 = vmatpush.bf16.msra.mxu2 %v1891_v16 }
  0xca   :  { %v792_v17 = vpop.f32.mrf.mxu2 }
  0xd2   :  { %v794_v24 = vpop.f32.mrf.mxu2 }
  0xd3   :  { %v766_v21 = vpop.f32.mrf.mxu0 }
  0xd4   :  { %v767_v23 = vadd.f32 %v766_v21, %v754_v20  ;;  %v91_v20 = vld [vmem:[#allocation8 + $0x2] ss:$0 sm:$0xff] }
  0xd6   :  { %v779_v25 = vpop.f32.mrf.mxu1 }
  0xd7   :  { %v780_v26 = vadd.f32 %v779_v25, %v767_v23 }
  0xd9   :  { %v793_v28 = vadd.f32 %v792_v17, %v780_v26  ;;  %v1898_v17 = vld [vmem:[#allocation7 + $0x18] sm:$0xff]  ;;  %v1895_v26 = vld [vmem:[#allocation7] sm:$0xff] }
  0xda   :  { %1216 = vmatpush.bf16.msra.mxu1 %v1898_v17 }
  0xdb   :  { %v887_v29 = vmax.f32 %v793_v28, 0.0  ;;  %v768_v31 = vpop.f32.mrf.mxu0  ;;  %v805_v35 = vpop.f32.mrf.mxu3 }
  0xdc   :  { %v806_v44 = vadd.f32 %v805_v35, %v208_v42 }
  0xdd   :  { %v889_v33 = vpack.c.bf16 %v887_v29, %v887_v29 }
  0xde   :  { %v818_v34 = vpop.f32.mrf.mxu2  ;;  %v781_v36 = vpop.f32.mrf.mxu1  ;;  %1217 = vmatpush.bf16.msra.mxu1 %v1897_v18 }
  0xdf   :  { %1027 = vmatmul.bf16.vlgmr.msrb.gmra.mxu1 %v889_v33  ;;  %v819_v46 = vadd.f32 %v818_v34, %v806_v44  ;;  %v93_v34 = vld [vmem:[#allocation8 + $0x4] ss:$0 sm:$0xff] }
  0xe2   :  { %1218 = vmatpush.bf16.msra.mxu1 %v1896_v19 }
  0xe3   :  { %v807_v41 = vpop.f32.mrf.mxu3 }
  0xe6   :  { %v820_v40 = vpop.f32.mrf.mxu2  ;;  %1219 = vmatpush.bf16.msra.mxu1 %v1895_v26 }
  0xf3   :  { %v831_v45 = vpop.f32.mrf.mxu0 }
  0xf4   :  { %v832_v48 = vadd.f32 %v831_v45, %v819_v46 }
  0xf6   :  { %v844_v47 = vpop.f32.mrf.mxu1 }
  0xf7   :  { %v845_v52 = vadd.f32 %v844_v47, %v832_v48 }
  0xfb   :  { %v857_v49 = vpop.f32.mrf.mxu3  ;;  %v833_v50 = vpop.f32.mrf.mxu0 }
  0xfc   :  { %v858_v54 = vadd.f32 %v857_v49, %v845_v52 }
  0xfe   :  { %v870_v53 = vpop.f32.mrf.mxu2  ;;  %v846_v55 = vpop.f32.mrf.mxu1 }
  0xff   :  { %v871_v56 = vadd.f32 %v870_v53, %v858_v54 }
 0x103   :  { %v859_v57 = vpop.f32.mrf.mxu3  ;;  %v883_v59 = vpop.f32.mrf.mxu0 }
 0x104   :  { %v884_v60 = vadd.f32 %v883_v59, %v871_v56 }
 0x106   :  { %v872_v61 = vpop.f32.mrf.mxu2  ;;  %v888_v62 = vmax.f32 %v884_v60, 0.0 }
 0x108   :  { %v890_v63 = vpack.c.bf16 %v888_v62, %v888_v62 }
 0x10a   :  { %1040 = vmatmul.bf16.vlgmr.msrb.gmra.mxu3 %v890_v63 }
 0x10b   :  { %v885_v0 = vpop.f32.mrf.mxu0 }
 0x15c   :  { %v1028_v7 = vpop.f32.mrf.mxu1 }
 0x15d   :  { %v1029_v11 = vadd.f32 %v1028_v7, %v90_v4 }
 0x164   :  { %v1030_v3 = vpop.f32.mrf.mxu1 }
 0x18d   :  { %v1041_v58 = vpop.f32.mrf.mxu3 }
 0x18e   :  { %v1042_v12 = vadd.f32 %v1041_v58, %v1029_v11 }
 0x190   :  { %v1045_v13 = vmax.f32 %v1042_v12, 0.0 }
 0x192   :  { %v1046_v14 = vpack.c.bf16 %v1045_v13, %v1045_v13 }
 0x194   :  { %1119 = vmatmul.bf16.vlgmr.msra.gmra.mxu0 %v1046_v14 }
 0x195   :  { %v1043_v15 = vpop.f32.mrf.mxu3 }
 0x211   :  { %v1120_v21 = vpop.f32.mrf.mxu0 }
 0x212   :  { %v1121_v22 = vadd.f32 %v1120_v21, %v91_v20 }
 0x214   :  { %v1124_v23 = vmax.f32 %v1121_v22, 0.0 }
 0x216   :  { %v1125_v24 = vpack.c.bf16 %v1124_v23, %v1124_v23 }
 0x218   :  { %1751 = vmatmul.msk.bf16.vlgmr.msra.gmra.mxu2 %vm1158_vm1, %v1125_v24 }
 0x219   :  { %v1122_v25 = vpop.f32.mrf.mxu0 }
 0x29b   :  { %v1171_v28 = vpop.f32.mrf.mxu2 }
 0x29c   :  { %v1172_v29 = vadd.f32 %v1171_v28, %v92_v27 }
 0x29e   :  { %v1175_v31 = vmax.f32 %v1172_v29, 0.0 }
 0x2a0   :  { %v1176_v32 = vpack.c.bf16 %v1175_v31, %v1175_v31 }
 0x2a2   :  { %1768 = vmatmul.msk.bf16.vlgmr.msra.gmra.mxu1 %vm1158_vm1, %v1176_v32 }
 0x2a3   :  { %v1173_v33 = vpop.f32.mrf.mxu2 }
 0x31f   :  { %v1221_v35 = vpop.f32.mrf.mxu1 }
 0x320   :  { %v1222_v36 = vadd.f32 %v1221_v35, %v93_v34 }
 0x322   :  { %1225 = vst [vmem:[#allocation10] sm:$0xff] %v1222_v36 }
 0x323   :  { %1236 = dma.vmem_to_hbm [thread:$0]  %s1232_s30, 128, %s1234_s10, [#allocation4]  }
 0x327   :  { %v1223_v38 = vpop.f32.mrf.mxu1 }
 0x328   :  { %2034 = dma.done.wait [#allocation4], 128  }
 0x329   :  { %2035 = vsyncadd [#allocation4], 4294967168 }
 0x32a   :  { %1241 = vsyncpa [#allocation3], 1 }
 0x32b   :  { %1242 = vsyncpa [#allocation6], 1 }
 0x32c   :  { %1243 = vsyncpa [#allocation9], 1 }
 0x32d   :  { %1244 = vsyncpa [#allocation4], 1 }

</bundles_post_ra>
